<compile_context>
chip_gen: v5e
topology: v5e:2x2
jax: 0.10.0
libtpu: 0.0.40
codegen_flags: <defaults>
</compile_context>

<pallas_src>
import functools

import jax
import jax.numpy as jnp
from jax.experimental import pallas as pl
from jax.experimental.pallas import tpu as pltpu


def _round_up(n, m):
    return ((n + m - 1) // m) * m


# --------------------------------------------------------------------------
# Kernel body: whole MLP on one [tile_m, K] activation tile. Intermediates
# stay in vregs; matmuls accumulate in f32 on the MXU; bias + ReLU in f32.
# --------------------------------------------------------------------------
def _fused_mlp_kernel(*refs, num_layers):
    x_ref, o_ref = refs[0], refs[-1]
    wb = refs[1:-1]

    h = x_ref[...]
    for i in range(num_layers):
        w = wb[2 * i][...]
        b = wb[2 * i + 1][...]                       # already f32
        y = jnp.dot(h.astype(w.dtype), w, preferred_element_type=jnp.float32)
        y = y + b
        if i < num_layers - 1:
            y = jnp.maximum(y, 0.0)
        h = y
    o_ref[...] = h.astype(o_ref.dtype)


# --------------------------------------------------------------------------
# One-time probe: is pipeline_mode=pl.Buffered(1) supported on a top-level
# BlockSpec?  If yes, resident weights are single-buffered (halves VMEM).
# --------------------------------------------------------------------------
_SINGLE_BUFFER_WEIGHTS = None


def _single_buffer_weights_supported():
    global _SINGLE_BUFFER_WEIGHTS
    if _SINGLE_BUFFER_WEIGHTS is not None:
        return _SINGLE_BUFFER_WEIGHTS
    try:
        def _k(x_ref, w_ref, o_ref):
            o_ref[...] = x_ref[...] + w_ref[...]

        probe = pl.pallas_call(
            _k,
            out_shape=jax.ShapeDtypeStruct((16, 128), jnp.float32),
            grid=(2,),
            in_specs=[
                pl.BlockSpec((8, 128), lambda i: (i, 0)),
                pl.BlockSpec((8, 128), lambda i: (0, 0),
                             pipeline_mode=pl.Buffered(1)),
            ],
            out_specs=pl.BlockSpec((8, 128), lambda i: (i, 0)),
        )(jnp.zeros((16, 128), jnp.float32), jnp.ones((8, 128), jnp.float32))
        jax.block_until_ready(probe)
        _SINGLE_BUFFER_WEIGHTS = bool(jnp.allclose(probe, 1.0))
    except Exception:
        _SINGLE_BUFFER_WEIGHTS = False
    return _SINGLE_BUFFER_WEIGHTS


# --------------------------------------------------------------------------
# One-time parameter preparation (hoisted out of the forward pass).
# --------------------------------------------------------------------------
def prepare_mlp_params(params, *, compute_dtype=jnp.bfloat16):
    """Pad/cast MLP params once.

    params: list of (w [in, out] (= torch weight.T), b [1, out] or [out]).
    compute_dtype: bf16 (default, MXU-native operands, f32 accumulation) or
    f32 for exactness.

    Contraction/hidden dims are padded only to the sublane multiple
    (8 f32 / 16 bf16); the final output dim is padded to a multiple of 128 so
    the kernel's HBM store is lane-dense. Zero padding is exact through ReLU.
    """
    num_layers = len(params)
    sub = 16 if jnp.dtype(compute_dtype) == jnp.dtype(jnp.bfloat16) else 8

    in_dim = params[0][0].shape[0]
    prev_pad = max(_round_up(in_dim, sub), sub)

    padded = []
    for idx, (w, b) in enumerate(params):
        k, n = w.shape
        last = idx == num_layers - 1
        n_pad = _round_up(n, 128) if last else max(_round_up(n, sub), sub)
        w_p = jnp.zeros((prev_pad, n_pad), compute_dtype)
        w_p = w_p.at[:k, :n].set(w.astype(compute_dtype))
        b_p = jnp.zeros((1, n_pad), jnp.float32)
        b_p = b_p.at[:, :n].set(b.reshape(1, -1).astype(jnp.float32))
        padded.append((w_p, b_p))
        prev_pad = n_pad

    resident = sum(
        w.shape[0] * w.shape[1] * jnp.dtype(w.dtype).itemsize
        + b.shape[0] * b.shape[1] * 4
        for (w, b) in padded)
    if resident > 48 * 1024 * 1024:
        # TODO(synk): weight-streaming fallback for v7x's 64 MiB VMEM (grid
        # axis over the widest layer's N with pl.when-init f32 accumulator, or
        # pltpu.emit_pipeline over K/N weight tiles) instead of full residency.
        raise NotImplementedError(
            "Resident padded weights exceed the VMEM-resident budget; "
            "weight streaming is not implemented.")

    _single_buffer_weights_supported()   # probe & cache eagerly (outside jit)
    return padded


# --------------------------------------------------------------------------
# Forward pass (jit-friendly): only the activation is padded per call.
# --------------------------------------------------------------------------
def mlp_forward(padded_params, x, *, out_dim, tile_m=None):
    """x: [..., input_dim] -> [..., out_dim]; matches PyTorch MLP.forward."""
    num_layers = len(padded_params)
    compute_dtype = padded_params[0][0].dtype
    cd_bytes = jnp.dtype(compute_dtype).itemsize
    sub = 16 if jnp.dtype(compute_dtype) == jnp.dtype(jnp.bfloat16) else 8

    lead_shape = x.shape[:-1]
    in_dim = x.shape[-1]
    K_pad = padded_params[0][0].shape[0]
    N_last = padded_params[-1][0].shape[1]

    x2d = x.reshape((-1, in_dim))
    M = x2d.shape[0]

    # Adaptive M tile: fill the 256-wide MXU (v6e/v7x) for big M and keep
    # >= 2 grid steps so "parallel" can shard across v7x's 2 TCs; shrink to the
    # sublane multiple for the tiny TransT shapes (launch/DMA-bound regime).
    if tile_m is None:
        if M >= 512:
            tile_m = 256
        elif M >= 128:
            tile_m = 128
        else:
            tile_m = max(_round_up(M, sub), sub)
    M_pad = max(_round_up(M, tile_m), tile_m)

    x_p = jnp.zeros((M_pad, K_pad), compute_dtype)
    x_p = x_p.at[:M, :in_dim].set(x2d.astype(compute_dtype))

    grid = (M_pad // tile_m,)

    single_buf = _single_buffer_weights_supported()
    wb_mode = dict(pipeline_mode=pl.Buffered(1)) if single_buf else {}

    in_specs = [pl.BlockSpec((tile_m, K_pad), lambda i: (i, 0))]
    flat_args = [x_p]
    for (w_p, b_p) in padded_params:
        in_specs.append(pl.BlockSpec(w_p.shape, lambda i: (0, 0), **wb_mode))
        in_specs.append(pl.BlockSpec(b_p.shape, lambda i: (0, 0), **wb_mode))
        flat_args += [w_p, b_p]

    out_dtype = x.dtype
    out_bytes = jnp.dtype(out_dtype).itemsize

    # --- VMEM budget: resident weights/biases (x buffer count) + pipelined
    # activation/output tiles + f32 intermediates, with headroom. ---
    wb_bufs = 1 if single_buf else 2
    weights_bytes = sum(
        w.shape[0] * w.shape[1] * jnp.dtype(w.dtype).itemsize
        + b.shape[0] * b.shape[1] * 4
        for (w, b) in padded_params)
    max_n = max(w.shape[1] for (w, _) in padded_params)
    stream_vmem = (2 * tile_m * K_pad * cd_bytes
                   + 2 * tile_m * N_last * out_bytes)
    interm_vmem = 2 * tile_m * max_n * 4
    vmem_limit = int(1.5 * (wb_bufs * weights_bytes + stream_vmem
                            + interm_vmem)) + (4 << 20)
    vmem_limit = min(max(vmem_limit, 8 << 20), 100 << 20)

    flops = 2 * M_pad * sum(w.shape[0] * w.shape[1]
                            for (w, _) in padded_params)
    bytes_accessed = (M_pad * K_pad * cd_bytes
                      + weights_bytes
                      + M_pad * N_last * out_bytes)

    kernel = functools.partial(_fused_mlp_kernel, num_layers=num_layers)

    out_padded = pl.pallas_call(
        kernel,
        out_shape=jax.ShapeDtypeStruct((M_pad, N_last), out_dtype),
        grid_spec=pl.GridSpec(
            grid=grid,
            in_specs=in_specs,
            out_specs=pl.BlockSpec((tile_m, N_last), lambda i: (i, 0)),
        ),
        compiler_params=pltpu.CompilerParams(
            dimension_semantics=("parallel",),
            vmem_limit_bytes=vmem_limit,
        ),
        cost_estimate=pl.CostEstimate(
            flops=flops, transcendentals=0, bytes_accessed=bytes_accessed),
    )(*flat_args)

    # NOTE(perf review): for large M this slice re-copies the padded output in
    # XLA; callers that can consume the lane-padded [M_pad, N_last] block
    # should skip it / fuse it into the following op.
    out = out_padded[:M, :out_dim]
    return out.reshape(lead_shape + (out_dim,))


# --------------------------------------------------------------------------
# Synthetic params + pure-JAX reference (for the self-test).
# --------------------------------------------------------------------------
def init_mlp_params(key, input_dim, hidden_dim, output_dim, num_layers,
                    dtype=jnp.float32):
    """Weights stored as [in, out] (= torch weight.T), biases [1, out]."""
    h = [hidden_dim] * (num_layers - 1)
    dims_in = [input_dim] + h
    dims_out = h + [output_dim]
    params = []
    for n_in, n_out in zip(dims_in, dims_out):
        key, kw, kb = jax.random.split(key, 3)
        bound = 1.0 / jnp.sqrt(jnp.asarray(n_in, jnp.float32))
        w = jax.random.uniform(kw, (n_in, n_out), dtype, -bound, bound)
        b = jax.random.uniform(kb, (1, n_out), dtype, -bound, bound)
        params.append((w, b))
    return params


def mlp_reference(params, x):
    num_layers = len(params)
    for i, (w, b) in enumerate(params):
        x = x @ w + b[0]
        if i < num_layers - 1:
            x = jax.nn.relu(x)
    return x


if __name__ == "__main__":
    # Shapes consistent with the TransT bbox_embed MLP usage:
    # (batch, seq, input_dim) transformer hidden states -> (batch, seq, 4).
    input_dim, hidden_dim, output_dim, num_layers = 32, 32, 4, 3
    batch, seq = 2, 8

    key = jax.random.PRNGKey(0)
    key, kx = jax.random.split(key)
    x = jax.random.normal(kx, (batch, seq, input_dim), dtype=jnp.float32)

    params = init_mlp_params(key, input_dim, hidden_dim, output_dim, num_layers)
    ref = mlp_reference(params, x)

    # Default path: bf16 MXU operands, f32 accumulation.
    prep_bf16 = prepare_mlp_params(params)
    fwd_bf16 = jax.jit(functools.partial(mlp_forward, prep_bf16,
                                         out_dim=output_dim))
    out_bf16 = jax.block_until_ready(fwd_bf16(x))
    assert out_bf16.shape == (batch, seq, output_dim), out_bf16.shape
    assert jnp.allclose(out_bf16, ref, atol=5e-2, rtol=5e-2), "bf16 mismatch"

    # Opt-in exactness path: f32 operands.
    prep_f32 = prepare_mlp_params(params, compute_dtype=jnp.float32)
    fwd_f32 = jax.jit(functools.partial(mlp_forward, prep_f32,
                                        out_dim=output_dim))
    out_f32 = jax.block_until_ready(fwd_f32(x))
    assert jnp.allclose(out_f32, ref, atol=1e-5, rtol=1e-5), "f32 mismatch"

    print("KERNEL_OK")
</pallas_src>

<mosaic_0001>
module attributes {stable_mosaic.version = 11 : i64} {
  func.func @_k(%arg0: i32, %arg1: memref<8x128xf32, #tpu.memory_space<vmem>>, %arg2: memref<8x128xf32, #tpu.memory_space<vmem>>, %arg3: memref<8x128xf32, #tpu.memory_space<vmem>>) attributes {dimension_semantics = [#tpu.dimension_semantics<arbitrary>], iteration_bounds = array<i64: 2>, scalar_prefetch = 0 : i64, scratch_operands = 0 : i64, tpu.core_type = #tpu.core_type<tc>, window_params = [{transform_indices = @transform_0, window_bounds = array<i64: 8, 128>}, {pipeline_mode = #tpu.pipeline_mode<synchronous>, transform_indices = @transform_1, window_bounds = array<i64: 8, 128>}, {transform_indices = @transform_2, window_bounds = array<i64: 8, 128>}]} {
    %c0 = arith.constant 0 : index
    %c0_0 = arith.constant 0 : index
    %0 = vector.load %arg1[%c0, %c0_0] : memref<8x128xf32, #tpu.memory_space<vmem>>, vector<8x128xf32>
    %c0_1 = arith.constant 0 : index
    %c0_2 = arith.constant 0 : index
    %1 = vector.load %arg2[%c0_1, %c0_2] : memref<8x128xf32, #tpu.memory_space<vmem>>, vector<8x128xf32>
    %2 = arith.addf %0, %1 : vector<8x128xf32>
    %c0_3 = arith.constant 0 : index
    %c0_4 = arith.constant 0 : index
    %3 = vector.load %arg3[%c0_3, %c0_4] : memref<8x128xf32, #tpu.memory_space<vmem>>, vector<8x128xf32>
    tpu.vector_store %arg3[%c0_3, %c0_4], %2 {strides = array<i32>} : memref<8x128xf32, #tpu.memory_space<vmem>>, vector<8x128xf32>,
    return
  }
  func.func @transform_0(%arg0: i32) -> (i32, i32) {
    %c0_i32 = arith.constant 0 : i32
    %c0_i32_0 = arith.constant 0 : i32
    return %arg0, %c0_i32 : i32, i32
  }
  func.func @transform_1(%arg0: i32) -> (i32, i32) {
    %c0_i32 = arith.constant 0 : i32
    %c0_i32_0 = arith.constant 0 : i32
    %c0_i32_1 = arith.constant 0 : i32
    return %c0_i32, %c0_i32_0 : i32, i32
  }
  func.func @transform_2(%arg0: i32) -> (i32, i32) {
    %c0_i32 = arith.constant 0 : i32
    %c0_i32_0 = arith.constant 0 : i32
    return %arg0, %c0_i32 : i32, i32
  }
}

module attributes {stable_mosaic.version = 11 : i64} {
  func.func @_fused_mlp_kernel(%arg0: i32, %arg1: memref<16x32xbf16, #tpu.memory_space<vmem>>, %arg2: memref<32x32xbf16, #tpu.memory_space<vmem>>, %arg3: memref<1x32xf32, #tpu.memory_space<vmem>>, %arg4: memref<32x32xbf16, #tpu.memory_space<vmem>>, %arg5: memref<1x32xf32, #tpu.memory_space<vmem>>, %arg6: memref<32x128xbf16, #tpu.memory_space<vmem>>, %arg7: memref<1x128xf32, #tpu.memory_space<vmem>>, %arg8: memref<16x128xf32, #tpu.memory_space<vmem>>) attributes {dimension_semantics = [#tpu.dimension_semantics<parallel>], iteration_bounds = array<i64: 1>, scalar_prefetch = 0 : i64, scratch_operands = 0 : i64, tpu.core_type = #tpu.core_type<tc>, window_params = [{transform_indices = @transform_0, window_bounds = array<i64: 16, 32>}, {pipeline_mode = #tpu.pipeline_mode<synchronous>, transform_indices = @transform_1, window_bounds = array<i64: 32, 32>}, {pipeline_mode = #tpu.pipeline_mode<synchronous>, transform_indices = @transform_2, window_bounds = array<i64: 1, 32>}, {pipeline_mode = #tpu.pipeline_mode<synchronous>, transform_indices = @transform_3, window_bounds = array<i64: 32, 32>}, {pipeline_mode = #tpu.pipeline_mode<synchronous>, transform_indices = @transform_4, window_bounds = array<i64: 1, 32>}, {pipeline_mode = #tpu.pipeline_mode<synchronous>, transform_indices = @transform_5, window_bounds = array<i64: 32, 128>}, {pipeline_mode = #tpu.pipeline_mode<synchronous>, transform_indices = @transform_6, window_bounds = array<i64: 1, 128>}, {transform_indices = @transform_7, window_bounds = array<i64: 16, 128>}]} {
    %c0 = arith.constant 0 : index
    %c0_0 = arith.constant 0 : index
    %0 = vector.load %arg1[%c0, %c0_0] : memref<16x32xbf16, #tpu.memory_space<vmem>>, vector<16x32xbf16>
    %c0_1 = arith.constant 0 : index
    %c0_2 = arith.constant 0 : index
    %1 = vector.load %arg2[%c0_1, %c0_2] : memref<32x32xbf16, #tpu.memory_space<vmem>>, vector<32x32xbf16>
    %c0_3 = arith.constant 0 : index
    %c0_4 = arith.constant 0 : index
    %2 = vector.load %arg3[%c0_3, %c0_4] : memref<1x32xf32, #tpu.memory_space<vmem>>, vector<1x32xf32>
    %cst = arith.constant dense<0.000000e+00> : vector<16x32xf32>
    %3 = tpu.matmul %0, %1, %cst {dimension_numbers = #tpu.dot_dimension_numbers<[1], [0], [0], [1], [0, 0, 1, 1], [], []>} : vector<16x32xbf16>, vector<32x32xbf16>, vector<16x32xf32> -> vector<16x32xf32>
    %4 = vector.broadcast %2 : vector<1x32xf32> to vector<16x32xf32>
    %5 = arith.addf %3, %4 : vector<16x32xf32>
    %cst_5 = arith.constant 0.000000e+00 : f32
    %6 = vector.broadcast %cst_5 : f32 to vector<16x32xf32>
    %7 = arith.maximumf %5, %6 : vector<16x32xf32>
    %c0_6 = arith.constant 0 : index
    %c0_7 = arith.constant 0 : index
    %8 = vector.load %arg4[%c0_6, %c0_7] : memref<32x32xbf16, #tpu.memory_space<vmem>>, vector<32x32xbf16>
    %c0_8 = arith.constant 0 : index
    %c0_9 = arith.constant 0 : index
    %9 = vector.load %arg5[%c0_8, %c0_9] : memref<1x32xf32, #tpu.memory_space<vmem>>, vector<1x32xf32>
    %10 = arith.truncf %7 : vector<16x32xf32> to vector<16x32xbf16>
    %cst_10 = arith.constant dense<0.000000e+00> : vector<16x32xf32>
    %11 = tpu.matmul %10, %8, %cst_10 {dimension_numbers = #tpu.dot_dimension_numbers<[1], [0], [0], [1], [0, 0, 1, 1], [], []>} : vector<16x32xbf16>, vector<32x32xbf16>, vector<16x32xf32> -> vector<16x32xf32>
    %12 = vector.broadcast %9 : vector<1x32xf32> to vector<16x32xf32>
    %13 = arith.addf %11, %12 : vector<16x32xf32>
    %cst_11 = arith.constant 0.000000e+00 : f32
    %14 = vector.broadcast %cst_11 : f32 to vector<16x32xf32>
    %15 = arith.maximumf %13, %14 : vector<16x32xf32>
    %c0_12 = arith.constant 0 : index
    %c0_13 = arith.constant 0 : index
    %16 = vector.load %arg6[%c0_12, %c0_13] : memref<32x128xbf16, #tpu.memory_space<vmem>>, vector<32x128xbf16>
    %c0_14 = arith.constant 0 : index
    %c0_15 = arith.constant 0 : index
    %17 = vector.load %arg7[%c0_14, %c0_15] : memref<1x128xf32, #tpu.memory_space<vmem>>, vector<1x128xf32>
    %18 = arith.truncf %15 : vector<16x32xf32> to vector<16x32xbf16>
    %cst_16 = arith.constant dense<0.000000e+00> : vector<16x128xf32>
    %19 = tpu.matmul %18, %16, %cst_16 {dimension_numbers = #tpu.dot_dimension_numbers<[1], [0], [0], [1], [0, 0, 1, 1], [], []>} : vector<16x32xbf16>, vector<32x128xbf16>, vector<16x128xf32> -> vector<16x128xf32>
    %20 = vector.broadcast %17 : vector<1x128xf32> to vector<16x128xf32>
    %21 = arith.addf %19, %20 : vector<16x128xf32>
    %c0_17 = arith.constant 0 : index
    %c0_18 = arith.constant 0 : index
    %22 = vector.load %arg8[%c0_17, %c0_18] : memref<16x128xf32, #tpu.memory_space<vmem>>, vector<16x128xf32>
    tpu.vector_store %arg8[%c0_17, %c0_18], %21 {strides = array<i32>} : memref<16x128xf32, #tpu.memory_space<vmem>>, vector<16x128xf32>,
    return
  }
  func.func @transform_0(%arg0: i32) -> (i32, i32) {
    %c0_i32 = arith.constant 0 : i32
    %c0_i32_0 = arith.constant 0 : i32
    return %arg0, %c0_i32 : i32, i32
  }
  func.func @transform_1(%arg0: i32) -> (i32, i32) {
    %c0_i32 = arith.constant 0 : i32
    %c0_i32_0 = arith.constant 0 : i32
    %c0_i32_1 = arith.constant 0 : i32
    return %c0_i32, %c0_i32_0 : i32, i32
  }
  func.func @transform_2(%arg0: i32) -> (i32, i32) {
    %c0_i32 = arith.constant 0 : i32
    %c0_i32_0 = arith.constant 0 : i32
    %c0_i32_1 = arith.constant 0 : i32
    return %c0_i32, %c0_i32_0 : i32, i32
  }
  func.func @transform_3(%arg0: i32) -> (i32, i32) {
    %c0_i32 = arith.constant 0 : i32
    %c0_i32_0 = arith.constant 0 : i32
    %c0_i32_1 = arith.constant 0 : i32
    return %c0_i32, %c0_i32_0 : i32, i32
  }
  func.func @transform_4(%arg0: i32) -> (i32, i32) {
    %c0_i32 = arith.constant 0 : i32
    %c0_i32_0 = arith.constant 0 : i32
    %c0_i32_1 = arith.constant 0 : i32
    return %c0_i32, %c0_i32_0 : i32, i32
  }
  func.func @transform_5(%arg0: i32) -> (i32, i32) {
    %c0_i32 = arith.constant 0 : i32
    %c0_i32_0 = arith.constant 0 : i32
    %c0_i32_1 = arith.constant 0 : i32
    return %c0_i32, %c0_i32_0 : i32, i32
  }
  func.func @transform_6(%arg0: i32) -> (i32, i32) {
    %c0_i32 = arith.constant 0 : i32
    %c0_i32_0 = arith.constant 0 : i32
    %c0_i32_1 = arith.constant 0 : i32
    return %c0_i32, %c0_i32_0 : i32, i32
  }
  func.func @transform_7(%arg0: i32) -> (i32, i32) {
    %c0_i32 = arith.constant 0 : i32
    %c0_i32_0 = arith.constant 0 : i32
    return %arg0, %c0_i32 : i32, i32
  }
}

</mosaic_0001>

<bundles_post_ra>
// kernel: tpu_custom_call.1
= control target key start
LH: loop header
LB: loop body
LE: loop exit
PB: predicated region body
PF: predicated region fallthrough
CT: control target
= control target key end

     0   :  { %7 = vsyncpa [#allocation3], 0  ;;  %s633_s0 = inlined_call_operand.hbm [shape: f32[16,128], index: 0, kind: input, shape index: {}]   ;;  %s634_s1 = inlined_call_operand.hbm [shape: f32[8,128], index: 1, kind: input, shape index: {}]   ;;  %s635_s2 = inlined_call_operand.hbm [shape: f32[16,128], index: 2, kind: output, shape index: {}]  }
   0x1   :  { %9 = vsyncpa [#allocation3 + $0x1], 0 }
   0x2   :  { %10 = vsyncpa [#allocation6], 0 }
   0x3   :  { %11 = vsyncpa [#allocation4], 0 }
   0x4   :  { %13 = vsyncpa [#allocation4 + $0x1], 0  ;;  %s495_s9 = smov 0   ;;  %s497_s10 = smov 0  }
   0x5   :  { %s499_s11 = smov 0   ;;  %s501_s12 = smov 0  }
   0x6 LB: > { %s516_s13 = sadd.s32 4294967295, %s477_s12   ;;  %s276_s14 = sadd.s32 4294967294, %s477_s12   ;;  %s477_s12 = sphi %s501_s12, %s645_s12   ;;  %s473_s11 = sphi %s499_s11, %s644_s11   ;;  %s469_s10 = sphi %s497_s10, %s643_s10   ;;  %s465_s9 = sphi %s495_s9, %s642_s9  }
   0x7   : > { %p39_p0 = scmp.ne.s32.totalorder %s469_s10, %s465_s9  ;;  %p40_p1 = scmp.eq.s32.totalorder %s516_s13, 0 }
   0x8   : > { %p84_p2 = scmp.eq.s32.totalorder %s516_s13, 1  ;;  %p90_p3 = scmp.eq.s32.totalorder %s276_s14, 1 }
   0x9   : > { %p525_p4 = por %p40_p1, %p39_p0  ;;  %p277_p5 = scmp.ge.s32.totalorder %s477_s12, 1 }
   0xa   : > { %p530_p6 = por %p90_p3, %p39_p0  ;;  %p97_p7 = scmp.lt.s32.totalorder %s477_s12, 3 }
   0xb   : > { %s109_s19 = sshll.u32 %s634_s1, 4  ;;  %s479_s21 = smov [#allocation5]   ;;  %s110_s19 = int_to_ptr.hbm [resolvable:$true] %s109_s19 }
   0xc   : > { %p538_p8 = pnand %p277_p5, %p97_p7  ;;  %s111_s22 = sshll.u32 %s479_s21, 4  ;;  %s112_s22 = int_to_ptr.vmem [resolvable:$true] %s111_s22 }
   0xd   : > { %s548_s23 = sadd.s32 1, %s477_s12   ;;  %s26_s24 = sadd.s32 1, %s473_s11 }
   0xe   : > { %p298_p10 = pneg %p538_p8  ;;  %s23_s25 = ssub.s32 %s477_s12, %s548_s23 }
   0xf   : > { %p24_p12 = scmp.eq.s32.totalorder %s23_s25, 0  ;;  %p33_p13 = scmp.ne.s32.totalorder %s473_s11, %s469_s10 }
  0x10   : > { %p299_p11 = pnand %p298_p10, %p40_p1  ;;  %p34_p0 = scmp.eq.s32.totalorder %s477_s12, 0 }
  0x11   : > { %s557_s26 = scalar_select %p24_p12, %s473_s11, %s26_s24  }
  0x12   : > { %301 = dma.hbm_to_vmem [thread:$0]  (!%p299_p11), %s110_s19, 128, %s112_s22, [#allocation6]  }
  0x13   : > { %p561_p3 = por %p84_p2, %p33_p13  ;;  %p311_p5 = scmp.lt.s32.totalorder %s477_s12, 2 }
  0x14   : > { %s122_s28 = sand.u32 1, %s473_s11   ;;  %s281_s29 = sshll.u32 %s477_s12, 3 }
  0x15   : > { %p35_p7 = por %p34_p0, %p33_p13  ;;  %s280_s30 = sshll.u32 %s122_s28, 3 }
  0x16   : > { %s130_s5 = scalar_lea.hbm %s633_s0, %s281_s29  ;;  %s126_s7 = scalar_lea.vmem [#allocation2], %s280_s30 }
  0x17   : > { %s132_s6 = sshll.u32 %s130_s5, 4  ;;  %s134_s8 = sshll.u32 %s126_s7, 4  ;;  %s133_s6 = int_to_ptr.hbm [resolvable:$true] %s132_s6  ;;  %s135_s8 = int_to_ptr.vmem [resolvable:$true] %s134_s8 }
  0x18   : > { %p571_p10 = pnand %p311_p5, %p35_p7  ;;  %s123_s17 = scalar_lea.sflag [#allocation3], %s122_s28 }
  0x19   : > { %s377_s18 = sshra.s32 %s133_s6, 4  ;;  %s384_s24 = scalar_lea.hbm %s633_s0, 16  ;;  %s378_s18 = int_to_ptr.hbm [resolvable:$true] %s377_s18 }
  0x1a   : > { %s379_s19 = scalar_lea.hbm %s378_s18, 8  ;;  %p381_p11 = pneg %p571_p10 }
  0x1b   : > { %p380_p2 = scmp.ne.s32.totalorder %s378_s18, %s379_s19  ;;  %p385_p0 = scmp.lt.s32.totalorder %s378_s18, %s633_s0 }
  0x1c   : > { %p386_p5 = scmp.lt.s32.totalorder %s384_s24, %s379_s19 }
  0x1d   : > { %p382_p12 = pnand %p381_p11, %p380_p2 }
  0x1e   : > { %p387_p7 = por %p386_p5, %p385_p0 }
  0x1f   : > { %p383_p13 = pneg %p382_p12 }
  0x21   : > { %p388_p9 = pnand %p387_p7, %p383_p13 }
  0x23   : > { %391 = shalt.err (!%p388_p9)
}
  0x24   : > { %305 = dma.hbm_to_vmem [thread:$0]  (!%p571_p10), %s133_s6, 128, %s135_s8, %s123_s17  }
  0x25   : > { %143 = sbr.rel (%p538_p8) target bundleno = 60 (0x3c), region = 28  ;;  %s588_s28 = sand.u32 (!%p538_p8), 1, %s469_s10  }
  0x26   : > { %s283_s30 = sshll.u32 (!%p538_p8), %s588_s28, 3  ;;  %s146_s3 = scalar_lea.sflag (!%p538_p8), [#allocation3], %s588_s28 }
  0x27   : > { %s149_s4 = scalar_lea.vmem (!%p538_p8), [#allocation2], %s283_s30 }
  0x2a   : > { %452 = dma.done.wait (%p525_p4), %s146_s3, 128  }
  0x2b   : > { %454 = vsyncadd (%p525_p4), %s146_s3, 4294967168 }
  0x2c   : > { %456 = dma.done.wait (%p40_p1), [#allocation6], 128  }
  0x2d   : > { %458 = vsyncadd (%p40_p1), [#allocation6], 4294967168  ;;  %s287_s20 = sshll.u32 %s516_s13, 3  ;;  %s175_s8 = scalar_lea.vmem [#allocation7], %s283_s30  ;;  %v176_v0 = vld [vmem:[%s149_s4] sm:$0xff]  ;;  %v177_v1 = vld [vmem:[#allocation5] sm:$0xff] }
  0x2e   : > { %s191_s7 = scalar_lea.hbm %s635_s2, %s287_s20  ;;  %s193_s14 = sshll.u32 %s175_s8, 4  ;;  %v178_v2 = vadd.f32 %v177_v1, %v176_v0  ;;  %s194_s14 = int_to_ptr.vmem [resolvable:$true] %s193_s14 }
  0x2f   : > { %s195_s17 = sshll.u32 %s191_s7, 4  ;;  %s181_s15 = scalar_lea.sflag [#allocation4], %s588_s28  ;;  %s196_s17 = int_to_ptr.hbm [resolvable:$true] %s195_s17 }
  0x30   : > { %179 = vst [vmem:[%s175_s8] sm:$0xff] %v178_v2  ;;  %s421_s18 = sshra.s32 %s196_s17, 4  ;;  %s427_s22 = scalar_lea.hbm %s635_s2, 16  ;;  %s422_s18 = int_to_ptr.hbm [resolvable:$true] %s421_s18 }
  0x31   : > { %s423_s19 = scalar_lea.hbm %s422_s18, 8  ;;  %p428_p9 = scmp.lt.s32.totalorder %s422_s18, %s635_s2 }
  0x32   : > { %p424_p1 = scmp.ne.s32.totalorder %s422_s18, %s423_s19  ;;  %p429_p10 = scmp.lt.s32.totalorder %s427_s22, %s423_s19 }
  0x34   : > { %p425_p4 = pnand %p424_p1, %p561_p3  ;;  %p430_p2 = por %p429_p10, %p428_p9 }
  0x36   : > { %p426_p8 = pneg %p425_p4 }
  0x38   : > { %p431_p11 = pnand %p430_p2, %p426_p8 }
  0x3a   : > { %434 = shalt.err (!%p431_p11)
}
  0x3b   : > { %296 = dma.vmem_to_hbm [thread:$0]  (%p561_p3), %s194_s14, 128, %s196_s17, %s181_s15  }
  0x3c PF: > { %s207_s29 = sand.u32 1, %s465_s9   ;;  %p641_p12 = scmp.ge.s32.totalorder %s477_s12, 2 }
  0x3d   : > { %s208_s28 = scalar_lea.sflag [#allocation4], %s207_s29 }
  0x3e   : > { %p307_p13 = pnand %p641_p12, %p530_p6 }
  0x40   : > { %p308_p0 = pneg %p307_p13 }
  0x42   : > { %460 = dma.done.wait (%p308_p0), %s208_s28, 128  }
  0x43   : > { %462 = vsyncadd (%p308_p0), %s208_s28, 4294967168  ;;  %p16_p5 = scmp.ge.s32.totalorder %s548_s23, 4   ;;  %s642_s9 = smov %s469_s10 }
  0x44   : > { %s643_s10 = smov %s473_s11  ;;  %s644_s11 = smov %s557_s26 }
  0x45   : > { %s645_s12 = smov %s548_s23  ;;  %18 = sbr.rel (!%p16_p5) target bundleno = 6 (0x6), region = 77 }
  0x4a   :  { %214 = vsyncpa [#allocation3], 1 }
  0x4b   :  { %216 = vsyncpa [#allocation3 + $0x1], 1 }
  0x4c   :  { %217 = vsyncpa [#allocation6], 1 }
  0x4d   :  { %218 = vsyncpa [#allocation4], 1 }
  0x4e   :  { %220 = vsyncpa [#allocation4 + $0x1], 1 }

// kernel: mlp_forward.1
= control target key start
LH: loop header
LB: loop body
LE: loop exit
PB: predicated region body
PF: predicated region fallthrough
CT: control target
= control target key end

     0   :  { %12 = vsyncpa [#allocation3], 0  ;;  %s366_s0 = inlined_call_operand.vmem [shape: bf16[16,32], index: 0, kind: input, shape index: {}]   ;;  %s367_s1 = inlined_call_operand.hbm [shape: bf16[32,32], index: 1, kind: input, shape index: {}]   ;;  %s368_s2 = inlined_call_operand.vmem [shape: f32[1,32], index: 2, kind: input, shape index: {}]   ;;  %s369_s3 = inlined_call_operand.hbm [shape: bf16[32,32], index: 3, kind: input, shape index: {}]   ;;  %s370_s4 = inlined_call_operand.vmem [shape: f32[1,32], index: 4, kind: input, shape index: {}]   ;;  %s371_s5 = inlined_call_operand.vmem [shape: bf16[32,128], index: 5, kind: input, shape index: {}]   ;;  %s372_s6 = inlined_call_operand.vmem [shape: f32[1,128], index: 6, kind: input, shape index: {}]   ;;  %s373_s7 = inlined_call_operand.vmem [shape: f32[16,128], index: 7, kind: output, shape index: {}]  }
   0x1   :  { %s20_s26 = sshll.u32 %s367_s1, 4  ;;  %s21_s26 = int_to_ptr.hbm [resolvable:$true] %s20_s26 }
   0x2   :  { %13 = vsyncpa [#allocation5], 0  ;;  %s289_s27 = smov [#allocation2]   ;;  %s35_s8 = sshll.u32 %s369_s3, 4  ;;  %s36_s8 = int_to_ptr.hbm [resolvable:$true] %s35_s8 }
   0x3   :  { %s22_s28 = sshll.u32 %s289_s27, 4  ;;  %s290_s9 = smov 64   ;;  %s23_s28 = int_to_ptr.vmem [resolvable:$true] %s22_s28 }
   0x4   :  { %s291_s10 = smov 4   ;;  %s292_s11 = smov [#allocation4]  }
   0x5   :  { %28 = dma.hbm_to_vmem [thread:$0]  %s21_s26, 256, %s23_s28, [#allocation3], %s290_s9, %s290_s9, %s291_s10  }
   0x6   :  { %s37_s12 = sshll.u32 %s292_s11, 4  ;;  %s38_s12 = int_to_ptr.vmem [resolvable:$true] %s37_s12 }
   0x7   :  { %43 = dma.hbm_to_vmem [thread:$0]  %s36_s8, 256, %s38_s12, [#allocation5], %s290_s9, %s290_s9, %s291_s10  }
   0x8   :  { %285 = dma.done.wait [#allocation3], 256  }
   0x9   :  { %286 = vsyncadd [#allocation3], 4294967040 }
   0xa   :  { %287 = dma.done.wait [#allocation5], 256  }
   0xb   :  { %288 = vsyncadd [#allocation5], 4294967040  ;;  %v225_v0 = vld [vmem:[#allocation2 + $0x8] sm:$0xff]  ;;  %v224_v1 = vld [vmem:[#allocation2] sm:$0xff]  ;;  %vm86_vm0 = vcmask 261120  }
   0xc   :  { %96 = vmatpush.bf16.msra.mxu0 %v225_v0  ;;  %v223_v2 = vld [vmem:[%s366_s0] sm:$0xff]  ;;  %v227_v3 = vld [vmem:[#allocation4 + $0x8] sm:$0xff]  ;;  %v226_v4 = vld [vmem:[#allocation4] sm:$0xff] }
   0xd   :  { %136 = vmatpush.bf16.msra.mxu1 %v227_v3  ;;  %v234_v6 = vld [vmem:[%s368_s2] ss:$0 sm:$0xff]  ;;  %v229_v13 = vld [vmem:[%s371_s5 + $0x8] sm:$0xff] }
   0xe   :  { %176 = vmatpush.bf16.msra.mxu2 %v229_v13  ;;  %v228_v14 = vld [vmem:[%s371_s5] sm:$0xff] }
   0xf   :  { %v235_v16 = vld [vmem:[%s370_s4] ss:$0 sm:$0xff] }
  0x10   :  { %97 = vmatpush.bf16.msra.mxu0 %v224_v1  ;;  %v236_v23 = vld [vmem:[%s372_s6] ss:$0 sm:$0xff] }
  0x11   :  { %137 = vmatpush.bf16.msra.mxu1 %v226_v4 }
  0x12   :  { %177 = vmatpush.bf16.msra.mxu2 %v228_v14 }
  0x13   :  { %204 = vmatmul.msk.bf16.vlgmr.msra.gmra.mxu0 %vm86_vm0, %v223_v2 }
  0x90   :  { %v99_v5 = vpop.f32.mrf.mxu0 }
  0x91   :  { %v100_v7 = vadd.f32 %v234_v6, %v99_v5 }
  0x93   :  { %v104_v10 = vmax.f32 %v100_v7, 0.0 }
  0x98   :  { %v101_v8 = vpop.f32.mrf.mxu0 }
  0x99   :  { %v102_v9 = vadd.f32 %v234_v6, %v101_v8 }
  0x9b   :  { %v105_v11 = vmax.f32 %v102_v9, 0.0 }
  0x9d   :  { %v111_v12 = vpack.c.bf16 %v105_v11, %v104_v10 }
  0x9f   :  { %213 = vmatmul.msk.bf16.vlgmr.msra.gmra.mxu1 %vm86_vm0, %v111_v12 }
 0x11c   :  { %v139_v15 = vpop.f32.mrf.mxu1 }
 0x11d   :  { %v140_v17 = vadd.f32 %v235_v16, %v139_v15 }
 0x11f   :  { %v144_v20 = vmax.f32 %v140_v17, 0.0 }
 0x124   :  { %v141_v18 = vpop.f32.mrf.mxu1 }
 0x125   :  { %v142_v19 = vadd.f32 %v235_v16, %v141_v18 }
 0x127   :  { %v145_v21 = vmax.f32 %v142_v19, 0.0 }
 0x129   :  { %v151_v22 = vpack.c.bf16 %v145_v21, %v144_v20 }
 0x12b   :  { %222 = vmatmul.msk.bf16.vlgmr.msra.gmra.mxu2 %vm86_vm0, %v151_v22 }
 0x1ae   :  { %v179_v24 = vpop.f32.mrf.mxu2 }
 0x1af   :  { %v180_v25 = vadd.f32 %v236_v23, %v179_v24 }
 0x1b1   :  { %184 = vst [vmem:[%s373_s7] sm:$0xff] %v180_v25 }
 0x1b6   :  { %v181_v26 = vpop.f32.mrf.mxu2 }
 0x1b7   :  { %v182_v27 = vadd.f32 %v236_v23, %v181_v26 }
 0x1b9   :  { %185 = vst [vmem:[%s373_s7 + $0x8] sm:$0xff] %v182_v27 }
 0x1ba   :  { %190 = vsyncpa [#allocation3], 1 }
 0x1bb   :  { %191 = vsyncpa [#allocation5], 1 }

</bundles_post_ra>
